<compile_context>
chip_gen: v6e
topology: v6e:2x2x1
jax: 0.10.0
libtpu: 0.0.40
codegen_flags: <defaults>
</compile_context>

<pallas_src>
import functools

import jax
import jax.numpy as jnp
from jax.experimental import pallas as pl
from jax.experimental.pallas import tpu as pltpu

_LANES = 128
_SUBLANES = 8


def _round_up(n, m):
    return ((n + m - 1) // m) * m


def _qvalue_kernel(x_ref, w1t_ref, b1t_ref, w2t_ref, b2t_ref, o_ref):
    # Batch-in-lanes: every tile is [features (sublanes), batch (lanes)].
    x_t = x_ref[...]                                                  # [S_pad, TB]
    # fc1 + ReLU:  h_T = relu(w1^T @ x^T + b1^T)  -> [H, TB]
    h = jnp.dot(w1t_ref[...], x_t, preferred_element_type=jnp.float32)
    h = jnp.maximum(h + b1t_ref[...], 0.0)                            # bias lane-broadcast
    # fc2:  out_T = w2^T @ h_T + b2^T             -> [A_pad, TB]
    out = jnp.dot(w2t_ref[...], h, preferred_element_type=jnp.float32)
    out = out + b2t_ref[...]
    o_ref[...] = out.astype(o_ref.dtype)                              # 8-sublane, lane-dense store


@functools.partial(jax.jit, static_argnames=("block_b",))
def qvalue_net(x, w1, b1, w2, b2, *, block_b=2048):
    """Fused MLP forward.  x: [B, state_dim]; w1: [state_dim, hidden];
    b1: [1, hidden]; w2: [hidden, action_dim]; b2: [1, action_dim].
    Returns [B, action_dim] (matches torch: fc2(relu(fc1(x))))."""
    B, state_dim = x.shape
    hidden = w1.shape[1]
    action_dim = w2.shape[1]

    f32 = jnp.float32
    s_pad = _round_up(state_dim, _SUBLANES)   # pad tiny contraction dim to 8 sublanes
    a_pad = _round_up(action_dim, _SUBLANES)  # output rows padded only to 8 sublanes

    # Batch tile (lane axis): multiple of 128; large tile amortizes per-step
    # overhead.  For moderate/large B force >=2 grid steps so the "parallel"
    # axis can be sharded across v7x's two TensorCores.
    b_lanes = _round_up(B, _LANES)
    tb = min(_round_up(block_b, _LANES), b_lanes)
    if b_lanes >= 2 * _LANES and tb >= b_lanes:
        tb = _round_up(pl.cdiv(b_lanes, 2), _LANES)
    n_blocks = pl.cdiv(b_lanes, tb)
    b_pad = n_blocks * tb

    # Transposed, zero-padded operands (all f32 so the (8,128) tiling holds).
    x_t = jnp.zeros((s_pad, b_pad), f32).at[:state_dim, :B].set(x.T.astype(f32))
    w1_t = jnp.zeros((hidden, s_pad), f32).at[:, :state_dim].set(w1.T.astype(f32))
    b1_t = b1.astype(f32).reshape(1, hidden).T                         # [H, 1]
    w2_t = jnp.zeros((a_pad, hidden), f32).at[:action_dim, :].set(w2.T.astype(f32))
    b2_t = jnp.zeros((a_pad, 1), f32).at[:action_dim, :].set(
        b2.astype(f32).reshape(action_dim, 1))

    flops = 2 * b_pad * (s_pad * hidden + hidden * a_pad)
    bytes_accessed = 4 * (x_t.size + w1_t.size + b1_t.size + w2_t.size
                          + b2_t.size + a_pad * b_pad)

    out_t = pl.pallas_call(
        _qvalue_kernel,
        out_shape=jax.ShapeDtypeStruct((a_pad, b_pad), f32),
        grid=(n_blocks,),
        in_specs=[
            pl.BlockSpec((s_pad, tb), lambda i: (0, i)),       # x^T: batch-tiled, lane-dense
            pl.BlockSpec((hidden, s_pad), lambda i: (0, 0)),   # w1^T: VMEM-resident
            pl.BlockSpec((hidden, 1), lambda i: (0, 0)),       # b1^T: resident
            pl.BlockSpec((a_pad, hidden), lambda i: (0, 0)),   # w2^T: resident
            pl.BlockSpec((a_pad, 1), lambda i: (0, 0)),        # b2^T: resident
        ],
        out_specs=pl.BlockSpec((a_pad, tb), lambda i: (0, i)),
        compiler_params=pltpu.CompilerParams(
            dimension_semantics=("parallel",),   # 2 TCs on v7x; no-op elsewhere
        ),
        cost_estimate=pl.CostEstimate(
            flops=flops, transcendentals=0, bytes_accessed=bytes_accessed),
    )(x_t, w1_t, b1_t, w2_t, b2_t)

    # Tiny post-slice/transpose back to [B, action_dim].
    return out_t[:action_dim, :B].T.astype(x.dtype)


def init_params(key, state_dim, hidden_dim, action_dim, dtype=jnp.float32):
    """Deterministic init mirroring torch.nn.Linear default
    (uniform(-1/sqrt(fan_in), 1/sqrt(fan_in)) for weight and bias).
    Weights stored as [in, out] (transposed vs. torch's [out, in])."""
    k1, k2, k3, k4 = jax.random.split(key, 4)
    bound1 = 1.0 / jnp.sqrt(state_dim)
    bound2 = 1.0 / jnp.sqrt(hidden_dim)
    w1 = jax.random.uniform(k1, (state_dim, hidden_dim), dtype, -bound1, bound1)
    b1 = jax.random.uniform(k2, (1, hidden_dim), dtype, -bound1, bound1)
    w2 = jax.random.uniform(k3, (hidden_dim, action_dim), dtype, -bound2, bound2)
    b2 = jax.random.uniform(k4, (1, action_dim), dtype, -bound2, bound2)
    return w1, b1, w2, b2


def reference(x, w1, b1, w2, b2):
    h = jnp.maximum(x @ w1 + b1, 0.0)
    return h @ w2 + b2


if __name__ == "__main__":
    # CartPole-v1: state_dim=4, action_dim=2; hidden_dim=128 per the script.
    state_dim, hidden_dim, action_dim = 4, 128, 2

    key = jax.random.PRNGKey(0)
    k_x, k_p, k_x2 = jax.random.split(key, 3)
    w1, b1, w2, b2 = init_params(k_p, state_dim, hidden_dim, action_dim)

    # Small batch (single grid step, exercises lane/sublane padding).
    batch = 2
    x = jax.random.normal(k_x, (batch, state_dim), jnp.float32)
    out = jax.block_until_ready(qvalue_net(x, w1, b1, w2, b2))
    ref = reference(x, w1, b1, w2, b2)
    assert out.shape == (batch, action_dim)
    assert jnp.allclose(out, ref, atol=1e-4, rtol=1e-5), "mismatch vs reference (small batch)"

    # Non-tile-multiple batch (exercises the multi-block grid + tile split).
    batch2 = 1000
    x2 = jax.random.normal(k_x2, (batch2, state_dim), jnp.float32)
    out2 = jax.block_until_ready(qvalue_net(x2, w1, b1, w2, b2))
    ref2 = reference(x2, w1, b1, w2, b2)
    assert out2.shape == (batch2, action_dim)
    assert jnp.allclose(out2, ref2, atol=1e-4, rtol=1e-5), "mismatch vs reference (batched grid)"

    print("KERNEL_OK")
</pallas_src>

<mosaic_0001>
module attributes {stable_mosaic.version = 11 : i64} {
  func.func @_qvalue_kernel(%arg0: i32, %arg1: memref<8x128xf32, #tpu.memory_space<vmem>>, %arg2: memref<128x8xf32, #tpu.memory_space<vmem>>, %arg3: memref<128x1xf32, #tpu.memory_space<vmem>>, %arg4: memref<8x128xf32, #tpu.memory_space<vmem>>, %arg5: memref<8x1xf32, #tpu.memory_space<vmem>>, %arg6: memref<8x128xf32, #tpu.memory_space<vmem>>) attributes {dimension_semantics = [#tpu.dimension_semantics<parallel>], iteration_bounds = array<i64: 1>, scalar_prefetch = 0 : i64, scratch_operands = 0 : i64, tpu.core_type = #tpu.core_type<tc>, window_params = [{transform_indices = @transform_0, window_bounds = array<i64: 8, 128>}, {pipeline_mode = #tpu.pipeline_mode<synchronous>, transform_indices = @transform_1, window_bounds = array<i64: 128, 8>}, {pipeline_mode = #tpu.pipeline_mode<synchronous>, transform_indices = @transform_2, window_bounds = array<i64: 128, 1>}, {pipeline_mode = #tpu.pipeline_mode<synchronous>, transform_indices = @transform_3, window_bounds = array<i64: 8, 128>}, {pipeline_mode = #tpu.pipeline_mode<synchronous>, transform_indices = @transform_4, window_bounds = array<i64: 8, 1>}, {transform_indices = @transform_5, window_bounds = array<i64: 8, 128>}]} {
    %c0 = arith.constant 0 : index
    %c0_0 = arith.constant 0 : index
    %0 = vector.load %arg1[%c0, %c0_0] : memref<8x128xf32, #tpu.memory_space<vmem>>, vector<8x128xf32>
    %c0_1 = arith.constant 0 : index
    %c0_2 = arith.constant 0 : index
    %1 = vector.load %arg2[%c0_1, %c0_2] : memref<128x8xf32, #tpu.memory_space<vmem>>, vector<128x8xf32>
    %cst = arith.constant dense<0.000000e+00> : vector<128x128xf32>
    %2 = tpu.matmul %1, %0, %cst {dimension_numbers = #tpu.dot_dimension_numbers<[1], [0], [0], [1], [0, 0, 1, 1], [], []>} : vector<128x8xf32>, vector<8x128xf32>, vector<128x128xf32> -> vector<128x128xf32>
    %c0_3 = arith.constant 0 : index
    %c0_4 = arith.constant 0 : index
    %3 = vector.load %arg3[%c0_3, %c0_4] : memref<128x1xf32, #tpu.memory_space<vmem>>, vector<128x1xf32>
    %4 = vector.broadcast %3 : vector<128x1xf32> to vector<128x128xf32>
    %5 = arith.addf %2, %4 : vector<128x128xf32>
    %cst_5 = arith.constant 0.000000e+00 : f32
    %6 = vector.broadcast %cst_5 : f32 to vector<128x128xf32>
    %7 = arith.maximumf %5, %6 : vector<128x128xf32>
    %c0_6 = arith.constant 0 : index
    %c0_7 = arith.constant 0 : index
    %8 = vector.load %arg4[%c0_6, %c0_7] : memref<8x128xf32, #tpu.memory_space<vmem>>, vector<8x128xf32>
    %cst_8 = arith.constant dense<0.000000e+00> : vector<8x128xf32>
    %9 = tpu.matmul %8, %7, %cst_8 {dimension_numbers = #tpu.dot_dimension_numbers<[1], [0], [0], [1], [0, 0, 1, 1], [], []>} : vector<8x128xf32>, vector<128x128xf32>, vector<8x128xf32> -> vector<8x128xf32>
    %c0_9 = arith.constant 0 : index
    %c0_10 = arith.constant 0 : index
    %10 = vector.load %arg5[%c0_9, %c0_10] : memref<8x1xf32, #tpu.memory_space<vmem>>, vector<8x1xf32>
    %11 = vector.broadcast %10 : vector<8x1xf32> to vector<8x128xf32>
    %12 = arith.addf %9, %11 : vector<8x128xf32>
    %c0_11 = arith.constant 0 : index
    %c0_12 = arith.constant 0 : index
    %13 = vector.load %arg6[%c0_11, %c0_12] : memref<8x128xf32, #tpu.memory_space<vmem>>, vector<8x128xf32>
    tpu.vector_store %arg6[%c0_11, %c0_12], %12 {strides = array<i32>} : memref<8x128xf32, #tpu.memory_space<vmem>>, vector<8x128xf32>,
    return
  }
  func.func @transform_0(%arg0: i32) -> (i32, i32) {
    %c0_i32 = arith.constant 0 : i32
    %c0_i32_0 = arith.constant 0 : i32
    return %c0_i32, %arg0 : i32, i32
  }
  func.func @transform_1(%arg0: i32) -> (i32, i32) {
    %c0_i32 = arith.constant 0 : i32
    %c0_i32_0 = arith.constant 0 : i32
    %c0_i32_1 = arith.constant 0 : i32
    return %c0_i32, %c0_i32_0 : i32, i32
  }
  func.func @transform_2(%arg0: i32) -> (i32, i32) {
    %c0_i32 = arith.constant 0 : i32
    %c0_i32_0 = arith.constant 0 : i32
    %c0_i32_1 = arith.constant 0 : i32
    return %c0_i32, %c0_i32_0 : i32, i32
  }
  func.func @transform_3(%arg0: i32) -> (i32, i32) {
    %c0_i32 = arith.constant 0 : i32
    %c0_i32_0 = arith.constant 0 : i32
    %c0_i32_1 = arith.constant 0 : i32
    return %c0_i32, %c0_i32_0 : i32, i32
  }
  func.func @transform_4(%arg0: i32) -> (i32, i32) {
    %c0_i32 = arith.constant 0 : i32
    %c0_i32_0 = arith.constant 0 : i32
    %c0_i32_1 = arith.constant 0 : i32
    return %c0_i32, %c0_i32_0 : i32, i32
  }
  func.func @transform_5(%arg0: i32) -> (i32, i32) {
    %c0_i32 = arith.constant 0 : i32
    %c0_i32_0 = arith.constant 0 : i32
    return %c0_i32, %arg0 : i32, i32
  }
}

</mosaic_0001>

<bundles_post_ra>
// kernel: qvalue_net.1
= control target key start
LH: loop header
LB: loop body
LE: loop exit
PB: predicated region body
PF: predicated region fallthrough
CT: control target
= control target key end

     0   :  { %vm133_vm0 = vcmask 64512   ;;  %v541_v3 = vmov 0   ;;  %v542_v35 = vmov 0.0   ;;  %vm543_vm1 = vmmov 0   ;;  %s727_s0 = inlined_call_operand.vmem [shape: f32[8,128], index: 0, kind: input, shape index: {}]   ;;  %s728_s1 = inlined_call_operand.vmem [shape: f32[128,8], index: 1, kind: input, shape index: {}]   ;;  %s729_s2 = inlined_call_operand.vmem [shape: f32[128,1], index: 2, kind: input, shape index: {}]   ;;  %s730_s4 = inlined_call_operand.vmem [shape: f32[8,1], index: 4, kind: input, shape index: {}]   ;;  %s731_s3 = inlined_call_operand.vmem [shape: f32[8,128], index: 3, kind: input, shape index: {}]   ;;  %s732_s5 = inlined_call_operand.vmem [shape: f32[8,128], index: 5, kind: output, shape index: {}]  }
   0x1   :  { %v20_v0 = vld [vmem:[%s727_s0] sm:$0xff]  ;;  %v22_v2 = vld [vmem:[%s728_s1 + $0x8] sm:$0xff]  ;;  %539 = vset.pattern.permute.xlu0 %v541_v3  ;;  %540 = vset.pattern.permute.xlu1 %v541_v3  ;;  %v23_v4 = vld [vmem:[%s728_s1 + $0x10] sm:$0xff] }
   0x2   :  { %v21_v1 = vld [vmem:[%s728_s1] sm:$0xff]  ;;  %475 = vmatprep.subr.mxu0 %v20_v0  ;;  %v24_v5 = vld [vmem:[%s728_s1 + $0x18] sm:$0xff]  ;;  %v50_v8 = vld [vmem:[%s729_s2 + $0x68] sm:$0xff]  ;;  %501 = vmatprep.subr.mxu1 %v542_v35 }
   0x3   :  { %477 = vmatprep.mubr.msk.f32.mxu0 %vm133_vm0, %v21_v1  ;;  %476 = vmatpush3.msra.mxu0 %v20_v0  ;;  %v25_v6 = vld [vmem:[%s728_s1 + $0x20] sm:$0xff]  ;;  %v52_v7 = vld [vmem:[%s729_s2 + $0x78] sm:$0xff]  ;;  %v51_v9 = vld [vmem:[%s729_s2 + $0x70] sm:$0xff] }
   0x4   :  { %478 = vmatmul.mubr.msk.f32.vlgmr.msra.gmra.mxu0 %vm133_vm0, %v22_v2  ;;  %130 = vperm.xlu0 %539, %v52_v7   ;;  %v26_v10 = vld [vmem:[%s728_s1 + $0x28] sm:$0xff]  ;;  %v49_v11 = vld [vmem:[%s729_s2 + $0x60] sm:$0xff]  ;;  %v27_v12 = vld [vmem:[%s728_s1 + $0x30] sm:$0xff] }
   0x5   :  { %480 = vmatprep.mubr.msk.f32.mxu0 %vm133_vm0, %v23_v4  ;;  %120 = vperm.xlu1 %540, %v50_v8   ;;  %v48_v13 = vld [vmem:[%s729_s2 + $0x58] sm:$0xff]  ;;  %v47_v15 = vld [vmem:[%s729_s2 + $0x50] sm:$0xff]  ;;  %v29_v16 = vld [vmem:[%s728_s1 + $0x40] sm:$0xff] }
   0x6   :  { %v28_v14 = vld [vmem:[%s728_s1 + $0x38] sm:$0xff]  ;;  %v46_v17 = vld [vmem:[%s729_s2 + $0x48] sm:$0xff]  ;;  %v45_v19 = vld [vmem:[%s729_s2 + $0x40] sm:$0xff]  ;;  %533 = vmatprep.mubr.msk.f32.mxu1 %vm543_vm1, %v542_v35 }
   0x7   :  { %v30_v18 = vld [vmem:[%s728_s1 + $0x48] sm:$0xff]  ;;  %v31_v20 = vld [vmem:[%s728_s1 + $0x50] sm:$0xff]  ;;  %v44_v21 = vld [vmem:[%s729_s2 + $0x38] sm:$0xff] }
   0x8   :  { %481 = vmatmul.mubr.msk.f32.gmra.mxu0 %vm133_vm0, %v24_v5  ;;  %125 = vperm.xlu0 %539, %v51_v9   ;;  %v32_v22 = vld [vmem:[%s728_s1 + $0x58] sm:$0xff]  ;;  %v43_v23 = vld [vmem:[%s729_s2 + $0x30] sm:$0xff]  ;;  %v33_v24 = vld [vmem:[%s728_s1 + $0x60] sm:$0xff] }
   0x9   :  { %483 = vmatprep.mubr.msk.f32.mxu0 %vm133_vm0, %v25_v6  ;;  %115 = vperm.xlu1 %540, %v49_v11   ;;  %v42_v25 = vld [vmem:[%s729_s2 + $0x28] sm:$0xff]  ;;  %v41_v27 = vld [vmem:[%s729_s2 + $0x20] sm:$0xff]  ;;  %v35_v28 = vld [vmem:[%s728_s1 + $0x70] sm:$0xff] }
   0xa   :  { %v34_v26 = vld [vmem:[%s728_s1 + $0x68] sm:$0xff]  ;;  %v40_v29 = vld [vmem:[%s729_s2 + $0x18] sm:$0xff]  ;;  %v39_v31 = vld [vmem:[%s729_s2 + $0x10] sm:$0xff] }
   0xb   :  { %v36_v30 = vld [vmem:[%s728_s1 + $0x78] sm:$0xff]  ;;  %v38_v32 = vld [vmem:[%s729_s2 + $0x8] sm:$0xff]  ;;  %v37_v33 = vld [vmem:[%s729_s2] sm:$0xff] }
   0xc   :  { %484 = vmatmul.mubr.msk.f32.gmra.mxu0 %vm133_vm0, %v26_v10  ;;  %110 = vperm.xlu0 %539, %v48_v13   ;;  %v344_v34 = vld [vmem:[%s730_s4] sm:$0xff] }
   0xd   :  { %486 = vmatprep.mubr.msk.f32.mxu0 %vm133_vm0, %v27_v12  ;;  %105 = vperm.xlu1 %540, %v47_v15  }
  0x10   :  { %487 = vmatmul.mubr.msk.f32.gmra.mxu0 %vm133_vm0, %v28_v14  ;;  %100 = vperm.xlu0 %539, %v46_v17  }
  0x11   :  { %489 = vmatprep.mubr.msk.f32.mxu0 %vm133_vm0, %v29_v16  ;;  %95 = vperm.xlu1 %540, %v45_v19  }
  0x14   :  { %490 = vmatmul.mubr.msk.f32.gmra.mxu0 %vm133_vm0, %v30_v18  ;;  %90 = vperm.xlu0 %539, %v44_v21  }
  0x15   :  { %492 = vmatprep.mubr.msk.f32.mxu0 %vm133_vm0, %v31_v20  ;;  %85 = vperm.xlu1 %540, %v43_v23  }
  0x18   :  { %493 = vmatmul.mubr.msk.f32.gmra.mxu0 %vm133_vm0, %v32_v22  ;;  %80 = vperm.xlu0 %539, %v42_v25  }
  0x19   :  { %495 = vmatprep.mubr.msk.f32.mxu0 %vm133_vm0, %v33_v24  ;;  %75 = vperm.xlu1 %540, %v41_v27  }
  0x1c   :  { %496 = vmatmul.mubr.msk.f32.gmra.mxu0 %vm133_vm0, %v34_v26  ;;  %70 = vperm.xlu0 %539, %v40_v29  }
  0x1d   :  { %498 = vmatprep.mubr.msk.f32.mxu0 %vm133_vm0, %v35_v28  ;;  %65 = vperm.xlu1 %540, %v39_v31  }
  0x20   :  { %499 = vmatmul.mubr.msk.f32.gmra.mxu0 %vm133_vm0, %v36_v30  ;;  %60 = vperm.xlu0 %539, %v38_v32  }
  0x21   :  { %55 = vperm.xlu1 %540, %v37_v33  }
  0x24   :  { %347 = vperm.xlu0 %539, %v344_v34  }
  0x7f   :  { %v131_v41 = vpop.permute.xlu0 %130 }
  0x80   :  { %v121_v43 = vpop.permute.xlu1 %120 }
  0x83   :  { %v126_v46 = vpop.permute.xlu0 %125 }
  0x84   :  { %v116_v48 = vpop.permute.xlu1 %115 }
  0x87   :  { %v111_v51 = vpop.permute.xlu0 %110 }
  0x88   :  { %v106_v53 = vpop.permute.xlu1 %105 }
  0x8b   :  { %v101_v56 = vpop.permute.xlu0 %100 }
  0x8c   :  { %v96_v59 = vpop.permute.xlu1 %95 }
  0x8f   :  { %v91_v2 = vpop.permute.xlu0 %90 }
  0x90   :  { %v86_v5 = vpop.permute.xlu1 %85 }
  0x93   :  { %v81_v10 = vpop.permute.xlu0 %80 }
  0x94   :  { %v76_v13 = vpop.permute.xlu1 %75 }
  0x97   :  { %v71_v18 = vpop.permute.xlu0 %70 }
  0x98   :  { %v66_v21 = vpop.permute.xlu1 %65 }
  0x9b   :  { %v61_v26 = vpop.permute.xlu0 %60 }
  0x9c   :  { %v56_v29 = vpop.permute.xlu1 %55 }
  0xc4   :  { %v694_v36 = vpop.f32.mrf.mxu0 }
  0xc5   :  { %v254_v30 = vadd.f32 %v694_v36, %v61_v26  ;;  %v343_v36 = vld [vmem:[%s731_s3] sm:$0xff] }
  0xc6   :  { %v696_v37 = vpop.f32.mrf.mxu0 }
  0xc7   :  { %v249_v32 = vadd.f32 %v696_v37, %v56_v29  ;;  %v328_v34 = vmax.f32 %v254_v30, 0.0 }
  0xc8   :  { %v698_v38 = vpop.f32.mrf.mxu0 }
  0xc9   :  { %v264_v24 = vadd.f32 %v698_v38, %v71_v18  ;;  %v327_v38 = vmax.f32 %v249_v32, 0.0 }
  0xca   :  { %v700_v39 = vpop.f32.mrf.mxu0 }
  0xcb   :  { %v259_v27 = vadd.f32 %v700_v39, %v66_v21  ;;  %v330_v31 = vmax.f32 %v264_v24, 0.0  ;;  %v348_v39 = vpop.permute.xlu0 %347 }
  0xcc   :  { %v485_v40 = vpop.f32.mrf.mxu0 }
  0xcd   :  { %v274_v19 = vadd.f32 %v485_v40, %v81_v10  ;;  %v329_v33 = vmax.f32 %v259_v27, 0.0 }
  0xce   :  { %v268_v42 = vpop.f32.mrf.mxu0 }
  0xcf   :  { %v269_v22 = vadd.f32 %v268_v42, %v76_v13  ;;  %v332_v25 = vmax.f32 %v274_v19, 0.0 }
  0xd0   :  { %v488_v44 = vpop.f32.mrf.mxu0 }
  0xd1   :  { %v284_v14 = vadd.f32 %v488_v44, %v91_v2  ;;  %v331_v28 = vmax.f32 %v269_v22, 0.0 }
  0xd2   :  { %v278_v45 = vpop.f32.mrf.mxu0 }
  0xd3   :  { %v279_v16 = vadd.f32 %v278_v45, %v86_v5  ;;  %v334_v20 = vmax.f32 %v284_v14, 0.0 }
  0xd4   :  { %v491_v47 = vpop.f32.mrf.mxu0 }
  0xd5   :  { %v294_v8 = vadd.f32 %v491_v47, %v101_v56  ;;  %v333_v23 = vmax.f32 %v279_v16, 0.0 }
  0xd6   :  { %v288_v49 = vpop.f32.mrf.mxu0 }
  0xd7   :  { %v289_v11 = vadd.f32 %v288_v49, %v96_v59  ;;  %v336_v15 = vmax.f32 %v294_v8, 0.0 }
  0xd8   :  { %v494_v50 = vpop.f32.mrf.mxu0 }
  0xd9   :  { %v304_v3 = vadd.f32 %v494_v50, %v111_v51  ;;  %v335_v17 = vmax.f32 %v289_v11, 0.0 }
  0xda   :  { %v298_v52 = vpop.f32.mrf.mxu0 }
  0xdb   :  { %v299_v6 = vadd.f32 %v298_v52, %v106_v53  ;;  %v338_v9 = vmax.f32 %v304_v3, 0.0 }
  0xdc   :  { %v497_v54 = vpop.f32.mrf.mxu0 }
  0xdd   :  { %v314_v61 = vadd.f32 %v497_v54, %v121_v43  ;;  %v337_v12 = vmax.f32 %v299_v6, 0.0 }
  0xde   :  { %v308_v55 = vpop.f32.mrf.mxu0 }
  0xdf   :  { %v309_v0 = vadd.f32 %v308_v55, %v116_v48  ;;  %v340_v4 = vmax.f32 %v314_v61, 0.0 }
  0xe0   :  { %v500_v57 = vpop.f32.mrf.mxu0 }
  0xe1   :  { %v324_v58 = vadd.f32 %v500_v57, %v131_v41  ;;  %v339_v7 = vmax.f32 %v309_v0, 0.0 }
  0xe2   :  { %v318_v60 = vpop.f32.mrf.mxu0 }
  0xe3   :  { %v342_v62 = vmax.f32 %v324_v58, 0.0  ;;  %v319_v63 = vadd.f32 %v318_v60, %v126_v46 }
  0xe5   :  { %v341_v1 = vmax.f32 %v319_v63, 0.0  ;;  %502 = vmatpush3.msra.mxu1 %v342_v62 }
  0xe6   :  { %503 = vmatprep.subr.mxu1 %v542_v35 }
  0xe7   :  { %504 = vmatpush3.msra.mxu1 %v341_v1 }
  0xe8   :  { %505 = vmatprep.subr.mxu1 %v542_v35 }
  0xe9   :  { %506 = vmatpush3.msra.mxu1 %v340_v4 }
  0xea   :  { %507 = vmatprep.subr.mxu1 %v542_v35 }
  0xeb   :  { %508 = vmatpush3.msra.mxu1 %v339_v7 }
  0xec   :  { %509 = vmatprep.subr.mxu1 %v542_v35 }
  0xed   :  { %510 = vmatpush3.msra.mxu1 %v338_v9 }
  0xee   :  { %511 = vmatprep.subr.mxu1 %v542_v35 }
  0xef   :  { %512 = vmatpush3.msra.mxu1 %v337_v12 }
  0xf0   :  { %513 = vmatprep.subr.mxu1 %v542_v35 }
  0xf1   :  { %514 = vmatpush3.msra.mxu1 %v336_v15 }
  0xf2   :  { %515 = vmatprep.subr.mxu1 %v542_v35 }
  0xf3   :  { %516 = vmatpush3.msra.mxu1 %v335_v17 }
  0xf4   :  { %517 = vmatprep.subr.mxu1 %v542_v35 }
  0xf5   :  { %518 = vmatpush3.msra.mxu1 %v334_v20 }
  0xf6   :  { %519 = vmatprep.subr.mxu1 %v542_v35 }
  0xf7   :  { %520 = vmatpush3.msra.mxu1 %v333_v23 }
  0xf8   :  { %521 = vmatprep.subr.mxu1 %v542_v35 }
  0xf9   :  { %522 = vmatpush3.msra.mxu1 %v332_v25 }
  0xfa   :  { %523 = vmatprep.subr.mxu1 %v542_v35 }
  0xfb   :  { %524 = vmatpush3.msra.mxu1 %v331_v28 }
  0xfc   :  { %525 = vmatprep.subr.mxu1 %v542_v35 }
  0xfd   :  { %526 = vmatpush3.msra.mxu1 %v330_v31 }
  0xfe   :  { %527 = vmatprep.subr.mxu1 %v542_v35 }
  0xff   :  { %528 = vmatpush3.msra.mxu1 %v329_v33 }
 0x100   :  { %529 = vmatprep.subr.mxu1 %v542_v35 }
 0x101   :  { %530 = vmatpush3.msra.mxu1 %v328_v34 }
 0x102   :  { %531 = vmatprep.subr.mxu1 %v542_v35 }
 0x103   :  { %532 = vmatpush3.msra.mxu1 %v327_v38 }
 0x104   :  { %534 = vmatmul.mubr.f32.vlgmr.msra.gmra.mxu1 %v343_v36 }
 0x1c4   :  { %v416_v37 = vpop.f32.mrf.mxu1 }
 0x1c5   :  { %v417_v40 = vadd.f32 %v416_v37, %v348_v39 }
 0x1c6   :  { %v535_v41 = vpop.f32.mrf.mxu1 }
 0x1c7   :  { %420 = vst [vmem:[%s732_s5] sm:$0xff] %v417_v40 }

</bundles_post_ra>
